<compile_context>
chip_gen: v6e
topology: v6e:2x2x1
jax: 0.10.0
libtpu: 0.0.40
codegen_flags: <defaults>
</compile_context>

<pallas_src>
import jax
import jax.numpy as jnp
import numpy as np
from jax.experimental import pallas as pl
from jax.experimental.pallas import tpu as pltpu


def _round_up(a, b):
    return (a + b - 1) // b * b


def _tpu_generation_info():
    """Returns (vmem_capacity_bytes, use_bf16_mxu)."""
    vmem_cap = 128 * 1024 * 1024
    use_bf16 = False
    try:
        info = pltpu.get_tpu_info()
        cap = getattr(info, "vmem_capacity_bytes", None)
        if cap:
            vmem_cap = int(cap)
    except Exception:
        pass
    try:
        kind = jax.devices()[0].device_kind.lower()
        if "v7" in kind:          # v7x: 64 MiB VMEM, bf16/fp8-only MXU
            use_bf16 = True
            vmem_cap = min(vmem_cap, 64 * 1024 * 1024)
    except Exception:
        pass
    return vmem_cap, use_bf16


def _kn_plan(K, N, tn_max=512, tk_max=2048):
    """Static (tk, K_pad, tn, N_pad) plan shared by prepare_weight & forward."""
    tn = min(tn_max, _round_up(N, 128))
    N_pad = _round_up(N, tn)
    K_pad = _round_up(K, 128)
    if K_pad <= tk_max:
        tk = K_pad
    else:
        tk = tk_max
        K_pad = _round_up(K, tk)
    return tk, K_pad, tn, N_pad


# ------------------------- stage 1: activation quant -------------------------

def _quant_per_token_kernel(dq_ref, x_ref, xq_ref, qs_ref):
    x = x_ref[...].astype(jnp.float32)                       # (tm_q, K_pad)
    qs = jnp.max(jnp.abs(x), axis=-1, keepdims=True) / 127.0  # matches torch .div(127)
    scaled = x / jnp.maximum(qs, 1e-30)                       # guard all-zero rows
    xq_ref[...] = jnp.clip(jnp.round(scaled), -128.0, 127.0).astype(jnp.int8)
    qs_ref[...] = qs * dq_ref[0]                              # fold dequant_scale


def _quant_per_tensor_kernel(x_ref, xq_ref):
    x = x_ref[...].astype(jnp.float32)
    xq_ref[...] = jnp.clip(jnp.round(x), -128.0, 127.0).astype(jnp.int8)


def _quantize_activations(x2, dq, per_token, tm_q, vmem_limit):
    """x2 is (M_pad, K_pad), M_pad % tm_q == 0. Returns int8 xq (+ scales)."""
    M, K = x2.shape
    if per_token:
        kernel = _quant_per_token_kernel
        in_specs = [pl.BlockSpec(memory_space=pltpu.MemorySpace.SMEM),
                    pl.BlockSpec((tm_q, K), lambda i: (i, 0))]
        args = (dq, x2)
        out_shape = (jax.ShapeDtypeStruct((M, K), jnp.int8),
                     jax.ShapeDtypeStruct((M, 1), jnp.float32))
        out_specs = (pl.BlockSpec((tm_q, K), lambda i: (i, 0)),
                     pl.BlockSpec((tm_q, 1), lambda i: (i, 0)))
    else:
        kernel = _quant_per_tensor_kernel
        in_specs = [pl.BlockSpec((tm_q, K), lambda i: (i, 0))]
        args = (x2,)
        out_shape = jax.ShapeDtypeStruct((M, K), jnp.int8)
        out_specs = pl.BlockSpec((tm_q, K), lambda i: (i, 0))

    return pl.pallas_call(
        kernel,
        out_shape=out_shape,
        grid_spec=pl.GridSpec(grid=(M // tm_q,), in_specs=in_specs,
                              out_specs=out_specs),
        compiler_params=pltpu.CompilerParams(
            dimension_semantics=("parallel",),
            vmem_limit_bytes=vmem_limit),
    )(*args)


# --------------------------- stage 2: int8 matmul ----------------------------

def _make_matmul_kernel(per_token, use_bias, use_bf16):
    def kernel(*refs):
        refs = list(refs)
        acc_ref = refs.pop()                  # scratch (last)
        o_ref = refs.pop()                    # output
        idx = 0
        dq_ref = None
        if not per_token:
            dq_ref = refs[idx]; idx += 1
        xq_ref = refs[idx]; idx += 1
        w_ref = refs[idx]; idx += 1
        qs_ref = None
        if per_token:
            qs_ref = refs[idx]; idx += 1
        b_ref = refs[idx] if use_bias else None

        k = pl.program_id(2)

        @pl.when(k == 0)
        def _():
            acc_ref[...] = jnp.zeros_like(acc_ref)

        if use_bf16:
            # v7x: no integer MXU datapath; int8 values are exact in bf16.
            acc_ref[...] += jnp.dot(
                xq_ref[...].astype(jnp.bfloat16),
                w_ref[...].astype(jnp.bfloat16),
                preferred_element_type=jnp.float32)
        else:
            # v5e/v6e: exact int8 x int8 -> int32 MXU contraction.
            acc_ref[...] += jax.lax.dot_general(
                xq_ref[...], w_ref[...],
                dimension_numbers=(((1,), (0,)), ((), ())),
                preferred_element_type=jnp.int32)

        @pl.when(k == pl.num_programs(2) - 1)
        def _():
            acc = acc_ref[...].astype(jnp.float32)
            if per_token:
                out = qs_ref[...] * acc            # scale already folds dequant_scale
            else:
                out = dq_ref[0] * acc
            if use_bias:
                out = out + b_ref[...]
            o_ref[...] = out.astype(o_ref.dtype)

    return kernel


# --------------------------------- wrappers ----------------------------------

def prepare_weight(weight_i8, tn_max=512, tk_max=2048):
    """One-time layout prep: (N, K) int8 -> padded, transposed (K_pad, N_pad).

    Do this at model-load time and reuse; it keeps the per-forward path free of
    an HBM->HBM transpose pass over the weight."""
    N, K = weight_i8.shape
    tk, K_pad, tn, N_pad = _kn_plan(K, N, tn_max, tk_max)
    wT = jnp.transpose(weight_i8)
    if (K_pad, N_pad) != (K, N):
        wT = jnp.pad(wT, ((0, K_pad - K), (0, N_pad - N)))
    return wT


def w8a8_linear(x, wT, out_features, dequant_scale, bias=None,
                act_quant="per-tensor", tm_max=512):
    """Pallas implementation of W8A8BFP32OFP32Linear.forward.

    `wT` must come from prepare_weight(weight) with the same defaults."""
    assert act_quant in ("per-token", "per-tensor")
    per_token = act_quant == "per-token"
    use_bias = bias is not None

    x_shape = x.shape
    out_dtype = x.dtype
    K = x_shape[-1]
    N = out_features
    tk, K_pad, tn, N_pad = _kn_plan(K, N)
    assert wT.shape == (K_pad, N_pad), "weight not prepared with prepare_weight()"

    vmem_cap, use_bf16 = _tpu_generation_info()

    x2 = x.reshape(-1, K)
    M = x2.shape[0]
    tm = min(tm_max, _round_up(M, 32))      # multiple of 32: int8 sublane packing
    M_pad = _round_up(M, tm)
    if M_pad != M or K_pad != K:
        x2 = jnp.pad(x2, ((0, M_pad - M), (0, K_pad - K)))

    dq = jnp.asarray(dequant_scale, jnp.float32).reshape(1)
    out_b = jnp.dtype(out_dtype).itemsize
    in_b = x2.dtype.itemsize

    # --- stage 1: quantize activations once (small row tile, explicit VMEM cap)
    tm_q = 32
    for cand in (256, 128, 64, 32):
        if tm % cand == 0:
            tm_q = min(tm, cand)
            break
    while tm_q > 32 and 2 * tm_q * K_pad * in_b > vmem_cap // 4:
        tm_q //= 2
    q_foot = (2 * tm_q * K_pad * in_b       # input tiles (double-buffered)
              + tm_q * K_pad * 4            # f32 cast intermediate
              + 2 * tm_q * K_pad            # int8 output tiles
              + 2 * tm_q * 4 + 4096)
    q_vmem = int(min(max(q_foot * 5 // 4, 8 << 20), vmem_cap * 3 // 4))

    if per_token:
        xq, qs = _quantize_activations(x2, dq, True, tm_q, q_vmem)
    else:
        xq = _quantize_activations(x2, dq, False, tm_q, q_vmem)
        qs = None

    # --- stage 2: tiled int8 matmul with K-split accumulator -----------------
    grid = (M_pad // tm, N_pad // tn, K_pad // tk)

    in_specs = []
    args = []
    if not per_token:
        in_specs.append(pl.BlockSpec(memory_space=pltpu.MemorySpace.SMEM))
        args.append(dq)
    in_specs += [pl.BlockSpec((tm, tk), lambda i, j, k: (i, k)),
                 pl.BlockSpec((tk, tn), lambda i, j, k: (k, j))]
    args += [xq, wT]
    if per_token:
        in_specs.append(pl.BlockSpec((tm, 1), lambda i, j, k: (i, 0)))
        args.append(qs)
    if use_bias:
        b = jnp.asarray(bias, jnp.float32).reshape(1, N)
        if N_pad != N:
            b = jnp.pad(b, ((0, 0), (0, N_pad - N)))
        in_specs.append(pl.BlockSpec((1, tn), lambda i, j, k: (0, j)))
        args.append(b)

    acc_dtype = jnp.float32 if use_bf16 else jnp.int32

    # Actual tile footprint (+25% headroom, small floor for Mosaic internals),
    # capped at 0.75x physical VMEM so the request is valid on every generation.
    mm_foot = (2 * tm * tk + 2 * tk * tn            # int8 activation / weight tiles
               + 2 * tm * tn * out_b                # output tiles
               + tm * tn * 4                        # accumulator scratch
               + tm * tn * 4                        # f32 epilogue temp
               + (tm * tk + tk * tn) * 2            # bf16 casts (v7x path)
               + 2 * tm * 4 + 2 * tn * 4 + 4096)
    mm_vmem = int(min(max(mm_foot * 5 // 4, 8 << 20), vmem_cap * 3 // 4))

    cost = pl.CostEstimate(
        flops=2 * M_pad * N_pad * K_pad,
        transcendentals=0,
        bytes_accessed=(M_pad * K_pad * (N_pad // tn)     # activation re-streaming
                        + K_pad * N_pad * (M_pad // tm)   # weight re-streaming
                        + M_pad * N_pad * out_b
                        + (M_pad * 4 if per_token else 0)
                        + (N_pad * 4 if use_bias else 0)),
    )

    out = pl.pallas_call(
        _make_matmul_kernel(per_token, use_bias, use_bf16),
        out_shape=jax.ShapeDtypeStruct((M_pad, N_pad), out_dtype),
        grid_spec=pltpu.PrefetchScalarGridSpec(
            num_scalar_prefetch=0,
            grid=grid,
            in_specs=in_specs,
            out_specs=pl.BlockSpec((tm, tn), lambda i, j, k: (i, j)),
            scratch_shapes=[pltpu.VMEM((tm, tn), acc_dtype)]),
        compiler_params=pltpu.CompilerParams(
            dimension_semantics=("parallel", "parallel", "arbitrary"),
            vmem_limit_bytes=mm_vmem),
        cost_estimate=cost,
    )(*args)

    out = out[:M, :N]
    return out.reshape(*x_shape[:-1], N)


# --------------------------------- reference ---------------------------------

def _reference(x, weight_i8, dequant_scale, bias, act_quant):
    x2 = x.reshape(-1, x.shape[-1]).astype(jnp.float32)
    if act_quant == "per-token":
        qs = jnp.max(jnp.abs(x2), axis=-1, keepdims=True) / 127.0
        xq = jnp.clip(jnp.round(x2 / jnp.maximum(qs, 1e-30)), -128, 127).astype(jnp.int8)
        dq = jnp.float32(dequant_scale) * qs
    else:
        xq = jnp.clip(jnp.round(x2), -128, 127).astype(jnp.int8)
        dq = jnp.float32(dequant_scale)
    acc = jnp.dot(xq.astype(jnp.int32), weight_i8.T.astype(jnp.int32))
    out = dq * acc.astype(jnp.float32)
    if bias is not None:
        out = out + bias.astype(jnp.float32)
    return out.reshape(*x.shape[:-1], -1).astype(x.dtype)


if __name__ == "__main__":
    # Small shapes consistent with a Linear forward: (batch, seq, in_features).
    batch, seq = 2, 8
    in_features, out_features = 128, 256

    key = jax.random.PRNGKey(0)
    kx, kw, kb = jax.random.split(key, 3)

    x = jax.random.normal(kx, (batch, seq, in_features), jnp.float32) * 4.0
    weight = jax.random.randint(kw, (out_features, in_features), -127, 128,
                                dtype=jnp.int8)
    bias = jax.random.normal(kb, (out_features,), jnp.float32)
    dequant_scale = jnp.float32(0.0123)

    # One-time weight layout prep (done at model-load time in real use).
    wT = jax.block_until_ready(prepare_weight(weight))

    ok = True
    for act_quant in ("per-tensor", "per-token"):
        for b in (None, bias):
            y = w8a8_linear(x, wT, out_features, dequant_scale, bias=b,
                            act_quant=act_quant)
            y = jax.block_until_ready(y)
            y_ref = _reference(x, weight, dequant_scale, b, act_quant)
            if not np.allclose(np.asarray(y), np.asarray(y_ref),
                               rtol=1e-5, atol=1e-4):
                ok = False
                err = np.max(np.abs(np.asarray(y) - np.asarray(y_ref)))
                print(f"MISMATCH act_quant={act_quant} bias={b is not None} "
                      f"max_err={err}")

    if ok:
        print("KERNEL_OK")
</pallas_src>

<mosaic_0001>
module attributes {stable_mosaic.version = 11 : i64} {
  func.func @_quant_per_tensor_kernel(%arg0: i32, %arg1: memref<32x128xf32, #tpu.memory_space<vmem>>, %arg2: memref<32x128xi8, #tpu.memory_space<vmem>>) attributes {dimension_semantics = [#tpu.dimension_semantics<parallel>], iteration_bounds = array<i64: 1>, scalar_prefetch = 0 : i64, scratch_operands = 0 : i64, tpu.core_type = #tpu.core_type<tc>, window_params = [{transform_indices = @transform_0, window_bounds = array<i64: 32, 128>}, {transform_indices = @transform_1, window_bounds = array<i64: 32, 128>}]} {
    %c0 = arith.constant 0 : index
    %c0_0 = arith.constant 0 : index
    %0 = vector.load %arg1[%c0, %c0_0] : memref<32x128xf32, #tpu.memory_space<vmem>>, vector<32x128xf32>
    %1 = math.roundeven %0 : vector<32x128xf32>
    %cst = arith.constant -1.280000e+02 : f32
    %cst_1 = arith.constant 1.270000e+02 : f32
    %2 = vector.broadcast %cst : f32 to vector<32x128xf32>
    %3 = arith.maximumf %2, %1 : vector<32x128xf32>
    %4 = vector.broadcast %cst_1 : f32 to vector<32x128xf32>
    %5 = arith.minimumf %4, %3 : vector<32x128xf32>
    %6 = arith.fptosi %5 : vector<32x128xf32> to vector<32x128xi8>
    %c0_2 = arith.constant 0 : index
    %c0_3 = arith.constant 0 : index
    %7 = vector.load %arg2[%c0_2, %c0_3] : memref<32x128xi8, #tpu.memory_space<vmem>>, vector<32x128xi8>
    tpu.vector_store %arg2[%c0_2, %c0_3], %6 {strides = array<i32>} : memref<32x128xi8, #tpu.memory_space<vmem>>, vector<32x128xi8>,
    return
  }
  func.func @transform_0(%arg0: i32) -> (i32, i32) {
    %c0_i32 = arith.constant 0 : i32
    %c0_i32_0 = arith.constant 0 : i32
    return %arg0, %c0_i32 : i32, i32
  }
  func.func @transform_1(%arg0: i32) -> (i32, i32) {
    %c0_i32 = arith.constant 0 : i32
    %c0_i32_0 = arith.constant 0 : i32
    return %arg0, %c0_i32 : i32, i32
  }
}

</mosaic_0001>

<bundles_post_ra>
// kernel: tpu_custom_call.1
= control target key start
LH: loop header
LB: loop body
LE: loop exit
PB: predicated region body
PF: predicated region fallthrough
CT: control target
= control target key end

     0   :  { %6 = vsyncpa [#allocation3], 0  ;;  %s162_s0 = inlined_call_operand.hbm [shape: f32[32,128], index: 0, kind: input, shape index: {}]   ;;  %s163_s1 = inlined_call_operand.hbm [shape: s8[32,128], index: 1, kind: output, shape index: {}]  }
   0x1   :  { %7 = vsyncpa [#allocation4], 0  ;;  %s142_s6 = smov [#allocation2]  }
   0x2   :  { %s13_s7 = sshll.u32 %s142_s6, 4  ;;  %s14_s7 = int_to_ptr.vmem [resolvable:$true] %s13_s7 }
   0x3   :  { %s106_s8 = scalar_lea.vmem %s14_s7, 512  ;;  %p111_p1 = scmp.lt.s32.totalorder %s14_s7, %s14_s7 }
   0x4   :  { %p107_p0 = scmp.ne.s32.totalorder %s14_s7, %s106_s8  ;;  %p112_p2 = scmp.lt.s32.totalorder %s106_s8, %s106_s8 }
   0x6   :  { %p113_p3 = por %p112_p2, %p111_p1 }
   0x8   :  { %p114_p4 = pnand %p113_p3, %p107_p0 }
   0xa   :  { %117 = shalt.err (!%p114_p4)
}
   0xb   :  { %s143_s9 = smov 128   ;;  %s144_s10 = smov 8  }
   0xc   :  { %19 = dma.hbm_to_vmem [thread:$0]  %s162_s0, 512, %s14_s7, [#allocation3], %s143_s9, %s143_s9, %s144_s10  }
   0xd   :  { %138 = dma.done.wait [#allocation3], 512  }
   0xe   :  { %139 = vsyncadd [#allocation3], 4294966784  ;;  %v23_v0 = vld [vmem:[#allocation2] sm:$0xff]  ;;  %v24_v1 = vld [vmem:[#allocation2 + $0x8] sm:$0xff]  ;;  %s145_s13 = smov [#allocation5]  }
   0xf   :  { %v25_v2 = vld [vmem:[#allocation2 + $0x10] sm:$0xff]  ;;  %v26_v3 = vld [vmem:[#allocation2 + $0x18] sm:$0xff]  ;;  %v74_v4 = vclampa-f32 %v23_v0, -128, 127  ;;  %v76_v5 = vclampa-f32 %v24_v1, -128, 127 }
  0x10   :  { %v78_v6 = vclampa-f32 %v25_v2, -128, 127  ;;  %v80_v7 = vclampa-f32 %v26_v3, -128, 127  ;;  %s61_s14 = sshll.u32 %s145_s13, 4  ;;  %s62_s14 = int_to_ptr.vmem [resolvable:$true] %s61_s14 }
  0x11   :  { %v84_v8 = vcvt.f32.s32 %v74_v4  ;;  %v87_v9 = vcvt.f32.s32 %v76_v5  ;;  %s118_s0 = scalar_lea.vmem %s62_s14, 128  ;;  %p123_p6 = scmp.lt.s32.totalorder %s62_s14, %s62_s14 }
  0x12   :  { %v90_v10 = vcvt.f32.s32 %v78_v6  ;;  %v93_v11 = vcvt.f32.s32 %v80_v7  ;;  %p119_p5 = scmp.ne.s32.totalorder %s62_s14, %s118_s0  ;;  %p124_p7 = scmp.lt.s32.totalorder %s118_s0, %s118_s0 }
  0x13   :  { %v51_v12 = vpack.c.b16 %v87_v9, %v84_v8 }
  0x14   :  { %v52_v13 = vpack.c.b16 %v93_v11, %v90_v10  ;;  %p125_p8 = por %p124_p7, %p123_p6 }
  0x16   :  { %v53_v14 = vpack.c.b8 %v52_v13, %v51_v12  ;;  %p126_p9 = pnand %p125_p8, %p119_p5 }
  0x18   :  { %54 = vst [vmem:[#allocation5] sm:$0xff] %v53_v14 }
  0x19   :  { %129 = shalt.err (!%p126_p9)
}
  0x1a   :  { %64 = dma.vmem_to_hbm [thread:$0]  %s62_s14, 128, %s163_s1, [#allocation4]  }
  0x1b   :  { %140 = dma.done.wait [#allocation4], 128  }
  0x1c   :  { %141 = vsyncadd [#allocation4], 4294967168 }
  0x1d   :  { %68 = vsyncpa [#allocation3], 1 }
  0x1e   :  { %69 = vsyncpa [#allocation4], 1 }

</bundles_post_ra>
